<compile_context>
chip_gen: v7x
topology: tpu7x:2x2x1
jax: 0.10.0
libtpu: 0.0.40
codegen_flags: <defaults>
</compile_context>

<pallas_src>
import math

import jax
import jax.numpy as jnp
from jax.experimental import pallas as pl
from jax.experimental.pallas import tpu as pltpu

_LANE = 128                              # vreg lane width
_SUBLANE = 8                             # vreg sublane height
_MAX_SLAB_COLS = 2048                    # lane width of the re-slabbed copy rows
_TARGET_BLOCK_BYTES = 2 * 1024 * 1024    # ~2 MiB/block -> 85-86%-of-roofline copy regime
_VMEM_LIMIT_BYTES = 32 * 1024 * 1024     # >> 2 bufs x (in+out) x 2 MiB; <= v7x physical


def _copy_kernel(x_ref, o_ref):
    # Flatten has no arithmetic; stream one lane-dense slab through VMEM.
    o_ref[...] = x_ref[...]


def _block_dims(rows, cols, itemsize):
    """Pick a (block_rows, block_cols) tile targeting ~_TARGET_BLOCK_BYTES.

    block_cols is a multiple of 128 (or the full extent if cols < 128);
    block_rows is a multiple of 8 (or the full extent).  Ragged tails are
    handled by the cdiv grid with masked boundary tiles.
    """
    if cols <= _LANE:
        bc = cols                                             # full extent
    else:
        bc = max(_LANE, (min(cols, _MAX_SLAB_COLS) // _LANE) * _LANE)
    row_budget = max(_SUBLANE, _TARGET_BLOCK_BYTES // (bc * itemsize))
    br = (row_budget // _SUBLANE) * _SUBLANE                  # multiple of 8
    if br >= rows:
        br = rows                                             # full extent
    return br, bc


def _tiled_copy_2d(arr2d):
    """Streaming tiled identity copy of a 2-D array (the flatten hot path)."""
    rows, cols = arr2d.shape
    itemsize = jnp.dtype(arr2d.dtype).itemsize
    br, bc = _block_dims(rows, cols, itemsize)
    grid = (pl.cdiv(rows, br), pl.cdiv(cols, bc))
    return pl.pallas_call(
        _copy_kernel,
        out_shape=jax.ShapeDtypeStruct((rows, cols), arr2d.dtype),
        grid_spec=pl.GridSpec(
            grid=grid,
            in_specs=[pl.BlockSpec((br, bc), lambda i, j: (i, j))],
            out_specs=pl.BlockSpec((br, bc), lambda i, j: (i, j)),
        ),
        compiler_params=pltpu.CompilerParams(
            # Every grid step touches a disjoint output slice.
            dimension_semantics=("parallel", "parallel"),
            vmem_limit_bytes=_VMEM_LIMIT_BYTES,
        ),
    )(arr2d)


@jax.jit
def flatten_pallas(x):
    """Equivalent of torch `x.view(x.size(0), -1)` for a contiguous input."""
    n = x.shape[0]
    f = math.prod(x.shape[1:]) if x.ndim > 1 else 1
    total = n * f

    if total % _LANE == 0:
        # Re-slab the copy as contiguous (rows, cols) blocks independent of
        # (N, F): cols = largest power-of-two multiple of 128 dividing total,
        # capped at _MAX_SLAB_COLS so there are rows left to pipeline over.
        cols = _LANE
        c = _LANE * 2
        while c <= _MAX_SLAB_COLS and total % c == 0:
            cols = c
            c *= 2
        rows = total // cols
    else:
        # Odd element count: tile the (N, F) view directly; blocks stay
        # 128-multiples wide with a masked tail tile (never one giant block).
        rows, cols = n, f

    slab = jnp.reshape(x, (rows, cols))      # metadata-only under jit
    out2d = _tiled_copy_2d(slab)
    return jnp.reshape(out2d, (n, f))        # metadata-only under jit


if __name__ == "__main__":
    key = jax.random.PRNGKey(0)
    # Small NCHW input consistent with the module's forward: (N, C, H, W)
    x = jax.random.normal(key, (2, 4, 16, 16), dtype=jnp.float32)

    # Reference semantics: torch x.view(x.size(0), -1) == row-major reshape.
    ref = jnp.reshape(x, (x.shape[0], -1))

    out = flatten_pallas(x)
    out = jax.block_until_ready(out)

    assert out.shape == (2, 4 * 16 * 16), out.shape
    assert out.dtype == x.dtype
    assert bool(jnp.array_equal(out, ref))

    print("KERNEL_OK")
</pallas_src>

<mosaic_0001>
module attributes {stable_mosaic.version = 11 : i64} {
  func.func @_copy_kernel(%arg0: i32, %arg1: i32, %arg2: memref<1x2048xf32, #tpu.memory_space<vmem>>, %arg3: memref<1x2048xf32, #tpu.memory_space<vmem>>) attributes {dimension_semantics = [#tpu.dimension_semantics<parallel>, #tpu.dimension_semantics<parallel>], iteration_bounds = array<i64: 1, 1>, scalar_prefetch = 0 : i64, scratch_operands = 0 : i64, tpu.core_type = #tpu.core_type<tc>, window_params = [{transform_indices = @transform_0, window_bounds = array<i64: 1, 2048>}, {transform_indices = @transform_1, window_bounds = array<i64: 1, 2048>}]} {
    %c0 = arith.constant 0 : index
    %c0_0 = arith.constant 0 : index
    %0 = vector.load %arg2[%c0, %c0_0] : memref<1x2048xf32, #tpu.memory_space<vmem>>, vector<1x2048xf32>
    %c0_1 = arith.constant 0 : index
    %c0_2 = arith.constant 0 : index
    %1 = vector.load %arg3[%c0_1, %c0_2] : memref<1x2048xf32, #tpu.memory_space<vmem>>, vector<1x2048xf32>
    tpu.vector_store %arg3[%c0_1, %c0_2], %0 {strides = array<i32>} : memref<1x2048xf32, #tpu.memory_space<vmem>>, vector<1x2048xf32>,
    return
  }
  func.func @transform_0(%arg0: i32, %arg1: i32) -> (i32, i32) {
    %c0_i32 = arith.constant 0 : i32
    return %arg0, %arg1 : i32, i32
  }
  func.func @transform_1(%arg0: i32, %arg1: i32) -> (i32, i32) {
    %c0_i32 = arith.constant 0 : i32
    return %arg0, %arg1 : i32, i32
  }
}

</mosaic_0001>

<bundles_post_ra>
// kernel: flatten_pallas.1
= control target key start
LH: loop header
LB: loop body
LE: loop exit
PB: predicated region body
PF: predicated region fallthrough
CT: control target
= control target key end

     0   :  { %s38_s0 = inlined_call_operand.vmem [shape: f32[1,2048], index: 0, kind: input, shape index: {}]   ;;  %s39_s1 = inlined_call_operand.vmem [shape: f32[1,2048], index: 1, kind: output, shape index: {}]  }
   0x1   :  { %v8_v0 = vld [vmem:[%s38_s0] sm:$0xff]  ;;  %v9_v1 = vld [vmem:[%s38_s0 + $0x8] sm:$0xff] }
   0x2   :  { %10 = vst [vmem:[%s39_s1] sm:$0xff] %v8_v0  ;;  %11 = vst [vmem:[%s39_s1 + $0x8] sm:$0xff] %v9_v1 }

</bundles_post_ra>
